<compile_context>
chip_gen: v7x
topology: tpu7x:2x2x1
jax: 0.10.0
libtpu: 0.0.40
codegen_flags: <defaults>
</compile_context>

<pallas_src>
import jax
import jax.numpy as jnp
from jax.experimental import pallas as pl
from jax.experimental.pallas import tpu as pltpu

IN_DIM = 3
HID_DIM = 128
OUT_DIM = 28 * 28     # 784


def _round_up(n, m):
    return ((n + m - 1) // m) * m


def _choose_tb(B, tb_max=1024):
    """Pick a batch tile: multiple of 8, >=2 tiles when possible, <= tb_max."""
    # Large tiles amortize the ~0.35us per-grid-step overhead; multiple tiles
    # give DMA/writeback overlap and let v7x shard tiles across both TCs.
    tb = min(tb_max, max(256, _round_up(pl.cdiv(B, 8), 8)))
    if B > 8 and pl.cdiv(B, tb) < 2:          # guarantee >= 2 tiles (v7x 2 TCs)
        tb = _round_up(pl.cdiv(B, 2), 8)
    tb = min(tb, _round_up(B, 8))             # never bigger than the (padded) batch
    return max(8, _round_up(tb, 8))


def padl_decoder_kernel(x_ref, w1_ref, b1_ref, w2_ref, b2_ref, o_ref):
    x = x_ref[...]            # (tb, 3)   f32
    w1 = w1_ref[...]          # (3, 128)  f32

    # Linear(3 -> 128): K=3 as three VPU broadcast multiply-adds
    # (lane-broadcast of the x column, sublane-broadcast of the w1 row).
    h = b1_ref[...]           # (1, 128) -> broadcasts to (tb, 128)
    for k in range(IN_DIM):   # unrolled at trace time
        h = h + x[:, k:k + 1] * w1[k:k + 1, :]
    h = jnp.maximum(h, 0.0)   # ReLU (VPU)

    # Linear(128 -> 784) on the MXU, f32 accumulation.
    out = jnp.dot(h, w2_ref[...], preferred_element_type=jnp.float32)
    o_ref[...] = (out + b2_ref[...]).astype(o_ref.dtype)


def padl_decoder(x, w1, b1, w2, b2, *, tb=None):
    """x: (B, 3) f32 -> (B, 784) f32. Batch-tiled, weights resident in VMEM."""
    B = x.shape[0]
    if tb is None:
        tb = _choose_tb(B)
    else:
        tb = max(8, _round_up(min(tb, _round_up(B, 8)), 8))
    grid = (pl.cdiv(B, tb),)

    b1_2d = b1.reshape(1, HID_DIM)
    b2_2d = b2.reshape(1, OUT_DIM)

    cost = pl.CostEstimate(
        flops=2 * B * (IN_DIM * HID_DIM + HID_DIM * OUT_DIM),
        transcendentals=0,
        bytes_accessed=(B * IN_DIM * 4            # x read (unpadded)
                        + IN_DIM * HID_DIM * 4    # w1
                        + HID_DIM * 4             # b1
                        + HID_DIM * OUT_DIM * 4   # w2
                        + OUT_DIM * 4             # b2
                        + B * OUT_DIM * 4),       # output write (dominant)
    )

    return pl.pallas_call(
        padl_decoder_kernel,
        out_shape=jax.ShapeDtypeStruct((B, OUT_DIM), jnp.float32),
        grid_spec=pltpu.PrefetchScalarGridSpec(
            num_scalar_prefetch=0,
            grid=grid,
            in_specs=[
                pl.BlockSpec((tb, IN_DIM), lambda i: (i, 0)),        # batch-tiled x (unpadded)
                pl.BlockSpec((IN_DIM, HID_DIM), lambda i: (0, 0)),   # w1 (resident)
                pl.BlockSpec((1, HID_DIM), lambda i: (0, 0)),        # b1 (resident)
                pl.BlockSpec((HID_DIM, OUT_DIM), lambda i: (0, 0)),  # w2 (resident)
                pl.BlockSpec((1, OUT_DIM), lambda i: (0, 0)),        # b2 (resident)
            ],
            out_specs=pl.BlockSpec((tb, OUT_DIM), lambda i: (i, 0)),
        ),
        compiler_params=pltpu.CompilerParams(
            dimension_semantics=("parallel",)),   # independent batch tiles (v7x 2 TCs)
        cost_estimate=cost,
    )(x, w1, b1_2d, w2, b2_2d)


def init_params(key):
    """Deterministic init mimicking PyTorch nn.Linear default (U[-1/sqrt(fan_in), 1/sqrt(fan_in)])."""
    k1, k2, k3, k4 = jax.random.split(key, 4)
    bound1 = 1.0 / jnp.sqrt(IN_DIM)
    bound2 = 1.0 / jnp.sqrt(HID_DIM)
    # Stored as (in, out) so the kernel does x @ w (PyTorch stores (out, in) and does x @ w.T).
    w1 = jax.random.uniform(k1, (IN_DIM, HID_DIM), jnp.float32, -bound1, bound1)
    b1 = jax.random.uniform(k2, (HID_DIM,), jnp.float32, -bound1, bound1)
    w2 = jax.random.uniform(k3, (HID_DIM, OUT_DIM), jnp.float32, -bound2, bound2)
    b2 = jax.random.uniform(k4, (OUT_DIM,), jnp.float32, -bound2, bound2)
    return w1, b1, w2, b2


if __name__ == "__main__":
    key = jax.random.PRNGKey(0)
    kx, kp = jax.random.split(key)
    B = 16                                   # small test batch -> 2 tiles of 8
    x = jax.random.normal(kx, (B, IN_DIM), jnp.float32)
    w1, b1, w2, b2 = init_params(kp)

    out = jax.block_until_ready(padl_decoder(x, w1, b1, w2, b2))

    # Pure-JAX reference of the same forward semantics.
    ref = jnp.maximum(x @ w1 + b1, 0.0) @ w2 + b2
    assert out.shape == (B, OUT_DIM)
    assert jnp.allclose(out, ref, atol=1e-4, rtol=1e-4)
    print("KERNEL_OK")
</pallas_src>

<mosaic_0001>
module attributes {stable_mosaic.version = 11 : i64} {
  func.func @padl_decoder_kernel(%arg0: i32, %arg1: memref<8x3xf32, #tpu.memory_space<vmem>>, %arg2: memref<3x128xf32, #tpu.memory_space<vmem>>, %arg3: memref<1x128xf32, #tpu.memory_space<vmem>>, %arg4: memref<128x784xf32, #tpu.memory_space<vmem>>, %arg5: memref<1x784xf32, #tpu.memory_space<vmem>>, %arg6: memref<8x784xf32, #tpu.memory_space<vmem>>) attributes {dimension_semantics = [#tpu.dimension_semantics<parallel>], iteration_bounds = array<i64: 2>, scalar_prefetch = 0 : i64, scratch_operands = 0 : i64, tpu.core_type = #tpu.core_type<tc>, window_params = [{transform_indices = @transform_0, window_bounds = array<i64: 8, 3>}, {pipeline_mode = #tpu.pipeline_mode<synchronous>, transform_indices = @transform_1, window_bounds = array<i64: 3, 128>}, {pipeline_mode = #tpu.pipeline_mode<synchronous>, transform_indices = @transform_2, window_bounds = array<i64: 1, 128>}, {pipeline_mode = #tpu.pipeline_mode<synchronous>, transform_indices = @transform_3, window_bounds = array<i64: 128, 784>}, {pipeline_mode = #tpu.pipeline_mode<synchronous>, transform_indices = @transform_4, window_bounds = array<i64: 1, 784>}, {transform_indices = @transform_5, window_bounds = array<i64: 8, 784>}]} {
    %c0 = arith.constant 0 : index
    %c0_0 = arith.constant 0 : index
    %0 = vector.load %arg1[%c0, %c0_0] : memref<8x3xf32, #tpu.memory_space<vmem>>, vector<8x3xf32>
    %c0_1 = arith.constant 0 : index
    %c0_2 = arith.constant 0 : index
    %1 = vector.load %arg2[%c0_1, %c0_2] : memref<3x128xf32, #tpu.memory_space<vmem>>, vector<3x128xf32>
    %c0_3 = arith.constant 0 : index
    %c0_4 = arith.constant 0 : index
    %2 = vector.load %arg3[%c0_3, %c0_4] : memref<1x128xf32, #tpu.memory_space<vmem>>, vector<1x128xf32>
    %3 = vector.extract_strided_slice %0 {offsets = [0, 0], sizes = [8, 1], strides = [1, 1]} : vector<8x3xf32> to vector<8x1xf32>
    %4 = vector.extract_strided_slice %1 {offsets = [0, 0], sizes = [1, 128], strides = [1, 1]} : vector<3x128xf32> to vector<1x128xf32>
    %5 = vector.broadcast %3 : vector<8x1xf32> to vector<8x128xf32>
    %6 = vector.broadcast %4 : vector<1x128xf32> to vector<8x128xf32>
    %7 = arith.mulf %5, %6 : vector<8x128xf32>
    %8 = vector.broadcast %2 : vector<1x128xf32> to vector<8x128xf32>
    %9 = arith.addf %8, %7 : vector<8x128xf32>
    %10 = vector.extract_strided_slice %0 {offsets = [0, 1], sizes = [8, 1], strides = [1, 1]} : vector<8x3xf32> to vector<8x1xf32>
    %11 = vector.extract_strided_slice %1 {offsets = [1, 0], sizes = [1, 128], strides = [1, 1]} : vector<3x128xf32> to vector<1x128xf32>
    %12 = vector.broadcast %10 : vector<8x1xf32> to vector<8x128xf32>
    %13 = vector.broadcast %11 : vector<1x128xf32> to vector<8x128xf32>
    %14 = arith.mulf %12, %13 : vector<8x128xf32>
    %15 = arith.addf %9, %14 : vector<8x128xf32>
    %16 = vector.extract_strided_slice %0 {offsets = [0, 2], sizes = [8, 1], strides = [1, 1]} : vector<8x3xf32> to vector<8x1xf32>
    %17 = vector.extract_strided_slice %1 {offsets = [2, 0], sizes = [1, 128], strides = [1, 1]} : vector<3x128xf32> to vector<1x128xf32>
    %18 = vector.broadcast %16 : vector<8x1xf32> to vector<8x128xf32>
    %19 = vector.broadcast %17 : vector<1x128xf32> to vector<8x128xf32>
    %20 = arith.mulf %18, %19 : vector<8x128xf32>
    %21 = arith.addf %15, %20 : vector<8x128xf32>
    %cst = arith.constant 0.000000e+00 : f32
    %22 = vector.broadcast %cst : f32 to vector<8x128xf32>
    %23 = arith.maximumf %21, %22 : vector<8x128xf32>
    %c0_5 = arith.constant 0 : index
    %c0_6 = arith.constant 0 : index
    %24 = vector.load %arg4[%c0_5, %c0_6] : memref<128x784xf32, #tpu.memory_space<vmem>>, vector<128x784xf32>
    %cst_7 = arith.constant dense<0.000000e+00> : vector<8x784xf32>
    %25 = tpu.matmul %23, %24, %cst_7 {dimension_numbers = #tpu.dot_dimension_numbers<[1], [0], [0], [1], [0, 0, 1, 1], [], []>} : vector<8x128xf32>, vector<128x784xf32>, vector<8x784xf32> -> vector<8x784xf32>
    %c0_8 = arith.constant 0 : index
    %c0_9 = arith.constant 0 : index
    %26 = vector.load %arg5[%c0_8, %c0_9] : memref<1x784xf32, #tpu.memory_space<vmem>>, vector<1x784xf32>
    %27 = vector.broadcast %26 : vector<1x784xf32> to vector<8x784xf32>
    %28 = arith.addf %25, %27 : vector<8x784xf32>
    %c0_10 = arith.constant 0 : index
    %c0_11 = arith.constant 0 : index
    %29 = vector.load %arg6[%c0_10, %c0_11] : memref<8x784xf32, #tpu.memory_space<vmem>>, vector<8x784xf32>
    tpu.vector_store %arg6[%c0_10, %c0_11], %28 {strides = array<i32>} : memref<8x784xf32, #tpu.memory_space<vmem>>, vector<8x784xf32>,
    return
  }
  func.func @transform_0(%arg0: i32) -> (i32, i32) {
    %c0_i32 = arith.constant 0 : i32
    %c0_i32_0 = arith.constant 0 : i32
    return %arg0, %c0_i32 : i32, i32
  }
  func.func @transform_1(%arg0: i32) -> (i32, i32) {
    %c0_i32 = arith.constant 0 : i32
    %c0_i32_0 = arith.constant 0 : i32
    %c0_i32_1 = arith.constant 0 : i32
    return %c0_i32, %c0_i32_0 : i32, i32
  }
  func.func @transform_2(%arg0: i32) -> (i32, i32) {
    %c0_i32 = arith.constant 0 : i32
    %c0_i32_0 = arith.constant 0 : i32
    %c0_i32_1 = arith.constant 0 : i32
    return %c0_i32, %c0_i32_0 : i32, i32
  }
  func.func @transform_3(%arg0: i32) -> (i32, i32) {
    %c0_i32 = arith.constant 0 : i32
    %c0_i32_0 = arith.constant 0 : i32
    %c0_i32_1 = arith.constant 0 : i32
    return %c0_i32, %c0_i32_0 : i32, i32
  }
  func.func @transform_4(%arg0: i32) -> (i32, i32) {
    %c0_i32 = arith.constant 0 : i32
    %c0_i32_0 = arith.constant 0 : i32
    %c0_i32_1 = arith.constant 0 : i32
    return %c0_i32, %c0_i32_0 : i32, i32
  }
  func.func @transform_5(%arg0: i32) -> (i32, i32) {
    %c0_i32 = arith.constant 0 : i32
    %c0_i32_0 = arith.constant 0 : i32
    return %arg0, %c0_i32 : i32, i32
  }
}

</mosaic_0001>

<bundles_post_ra>
// kernel: tpu_custom_call.1
= control target key start
LH: loop header
LB: loop body
LE: loop exit
PB: predicated region body
PF: predicated region fallthrough
CT: control target
= control target key end

     0   :  { %10 = vsyncpa [#allocation3], 0  ;;  %s1598_s0 = inlined_call_operand.vmem [shape: f32[16,3], index: 0, kind: input, shape index: {}]   ;;  %s1599_s1 = inlined_call_operand.vmem [shape: f32[3,128], index: 1, kind: input, shape index: {}]   ;;  %s1600_s2 = inlined_call_operand.vmem [shape: f32[1,128], index: 2, kind: input, shape index: {}]   ;;  %s1601_s3 = inlined_call_operand.vmem [shape: f32[128,784], index: 3, kind: input, shape index: {}]   ;;  %s1602_s4 = inlined_call_operand.vmem [shape: f32[1,784], index: 4, kind: input, shape index: {}]   ;;  %s1603_s5 = inlined_call_operand.hbm [shape: f32[16,784], index: 5, kind: output, shape index: {}]  }
   0x1   :  { %12 = vsyncpa [#allocation3 + $0x1], 0  ;;  %s1108_s18 = smov 0   ;;  %s1110_s19 = smov 0  }
   0x2   :  { %s1112_s20 = smov 0   ;;  %s1114_s21 = smov 0  }
   0x3 LB: > { %s1129_s22 = sadd.s32 4294967295, %s1069_s21   ;;  %s775_s23 = sadd.s32 4294967294, %s1069_s21   ;;  %s1069_s21 = sphi %s1114_s21, %s1609_s21   ;;  %s1065_s20 = sphi %s1112_s20, %s1608_s20   ;;  %s1061_s19 = sphi %s1110_s19, %s1607_s19   ;;  %s1057_s18 = sphi %s1108_s18, %s1606_s18  }
   0x4   : > { %s1133_s24 = sadd.s32 1, %s1069_s21   ;;  %s135_s25 = sadd.s32 1, %s1065_s20 }
   0x5   : > { %s132_s26 = ssub.s32 %s1069_s21, %s1133_s24  ;;  %p145_p0 = scmp.ne.s32.totalorder %s1065_s20, %s1061_s19 }
   0x6   : > { %p133_p1 = scmp.eq.s32.totalorder %s132_s26, 0  ;;  %p146_p2 = scmp.eq.s32.totalorder %s1129_s22, 1 }
   0x7   : > { %p151_p3 = scmp.ne.s32.totalorder %s1061_s19, %s1057_s18  ;;  %p152_p4 = scmp.eq.s32.totalorder %s775_s23, 1 }
   0x8   : > { %s1144_s27 = scalar_select %p133_p1, %s1065_s20, %s135_s25  }
   0x9   : > { %p1146_p5 = por %p146_p2, %p145_p0  ;;  %p1150_p6 = por %p152_p4, %p151_p3 }
   0xa   : > { %p778_p7 = scmp.ge.s32.totalorder %s1069_s21, 1  ;;  %p189_p8 = scmp.lt.s32.totalorder %s1069_s21, 3 }
   0xc   : > { %p190_p9 = pnand %p778_p7, %p189_p8 }
   0xd   : > { %p216_p10 = scmp.lt.s32.totalorder (!%p190_p9), %s1129_s22, 1  ;;  %v262_v0 = vld [vmem:[%s1601_s3 + $0x8] sm:$0xff] (!%p190_p9)  ;;  %v269_v1 = vld [vmem:[%s1601_s3 + $0x40] sm:$0xff] (!%p190_p9)  ;;  %v1071_v2 = vmov (!%p190_p9), 0   ;;  %v1072_v3 = vmov (!%p190_p9), 2   ;;  %v264_v5 = vld [vmem:[%s1601_s3 + $0x18] sm:$0xff] (!%p190_p9) }
   0xe   : > { %193 = sbr.rel (%p190_p9) target bundleno = 428 (0x1ac), region = 40  ;;  %1003 = vset.pattern.permute.xlu0 (!%p190_p9), %v1071_v2  ;;  %1005 = vset.pattern.permute.xlu1 (!%p190_p9), %v1072_v3  ;;  %v836_v4 = vpack.c.bf16 (!%p190_p9), %v269_v1, %v262_v0  ;;  %v271_v6 = vld [vmem:[%s1601_s3 + $0x50] sm:$0xff] (!%p190_p9)  ;;  %v261_v7 = vld [vmem:[%s1601_s3] sm:$0xff] (!%p190_p9)  ;;  %v268_v9 = vld [vmem:[%s1601_s3 + $0x38] sm:$0xff] (!%p190_p9)  ;;  %v1073_v48 = vmov (!%p190_p9), 1   ;;  %vm1076_vm0 = vmmov (!%p190_p9), 0  }
   0xf   : > { %v868_v8 = vpack.c.bf16 (!%p190_p9), %v271_v6, %v264_v5  ;;  %v263_v10 = vld [vmem:[%s1601_s3 + $0x10] sm:$0xff] (!%p190_p9)  ;;  %v270_v11 = vld [vmem:[%s1601_s3 + $0x48] sm:$0xff] (!%p190_p9)  ;;  %v838_v12 = vpack.c.bf16 (!%p190_p9), %v268_v9, %v261_v7  ;;  %v276_v14 = vld [vmem:[%s1601_s3 + $0x78] sm:$0xff] (!%p190_p9)  ;;  %s213_s14 = sand.u32 (!%p190_p9), 1, %s1061_s19   ;;  %s957_s26 = smul.u32 (!%p190_p9), 896, %s1129_s22  ;;  %vm699_vm1 = vcmask (!%p190_p9), 130048  }
  0x10   : > { %837 = vmatprep.subr.bf16.mxu0 (!%p190_p9), %v836_v4  ;;  %v870_v13 = vpack.c.bf16 (!%p190_p9), %v270_v11, %v263_v10  ;;  %v283_v15 = vld [vmem:[%s1601_s3 + $0xb0] sm:$0xff] (!%p190_p9)  ;;  %v278_v16 = vld [vmem:[%s1601_s3 + $0x88] sm:$0xff] (!%p190_p9)  ;;  %v285_v18 = vld [vmem:[%s1601_s3 + $0xc0] sm:$0xff] (!%p190_p9)  ;;  %s956_s23 = smul.u32 (!%p190_p9), 56, %s213_s14  ;;  %s1077_s9 = smov (!%p190_p9), [#allocation2]  }
  0x11   : > { %869 = vmatprep.subr.bf16.mxu1 (!%p190_p9), %v868_v8  ;;  %v840_v17 = vpack.c.bf16 (!%p190_p9), %v283_v15, %v276_v14  ;;  %v275_v19 = vld [vmem:[%s1601_s3 + $0x70] sm:$0xff] (!%p190_p9)  ;;  %v282_v20 = vld [vmem:[%s1601_s3 + $0xa8] sm:$0xff] (!%p190_p9)  ;;  %839 = vmatpush1.bf16.msra.mxu0 (!%p190_p9), %v838_v12  ;;  %v872_v21 = vpack.c.bf16 (!%p190_p9), %v285_v18, %v278_v16  ;;  %v277_v23 = vld [vmem:[%s1601_s3 + $0x80] sm:$0xff] (!%p190_p9)  ;;  %v1074_v14 = vmov (!%p190_p9), 0.0   ;;  %s1554_s7 = scalar_lea.hbm (!%p190_p9), %s1603_s5, %s957_s26  ;;  %s1011_s10 = sshll.u32 (!%p190_p9), %s1077_s9, 4  ;;  %s1012_s10 = int_to_ptr.vmem [resolvable:$false] %s1011_s10 }
  0x12   : > { %871 = vmatpush1.bf16.msra.mxu1 (!%p190_p9), %v870_v13  ;;  %v842_v22 = vpack.c.bf16 (!%p190_p9), %v282_v20, %v275_v19  ;;  %v284_v24 = vld [vmem:[%s1601_s3 + $0xb8] sm:$0xff] (!%p190_p9)  ;;  %v290_v25 = vld [vmem:[%s1601_s3 + $0xe8] sm:$0xff] (!%p190_p9)  ;;  %v297_v28 = vld [vmem:[%s1601_s3 + $0x120] sm:$0xff] (!%p190_p9)  ;;  %474 = vmatprep.mubr.f32.mxu0 (!%p190_p9), %v1074_v14  ;;  %s215_s25 = scalar_lea.vmem (!%p190_p9), [#allocation2], %s956_s23  ;;  %s1013_s11 = scalar_lea.vmem (!%p190_p9), %s1012_s10, 1792 }
  0x13   : > { %841 = vmatprep.subr.bf16.mxu0 (!%p190_p9), %v840_v17  ;;  %v874_v27 = vpack.c.bf16 (!%p190_p9), %v284_v24, %v277_v23  ;;  %v292_v29 = vld [vmem:[%s1601_s3 + $0xf8] sm:$0xff] (!%p190_p9)  ;;  %v844_v30 = vpack.c.bf16 (!%p190_p9), %v297_v28, %v290_v25  ;;  %v299_v31 = vld [vmem:[%s1601_s3 + $0x130] sm:$0xff] (!%p190_p9)  ;;  %v289_v32 = vld [vmem:[%s1601_s3 + $0xe0] sm:$0xff] (!%p190_p9)  ;;  %873 = vmatprep.subr.bf16.mxu1 (!%p190_p9), %v872_v21  ;;  %s716_s30 = sshll.u32 (!%p190_p9), %s215_s25, 4  ;;  %s1556_s30 = int_to_ptr.vmem [resolvable:$true] %s716_s30 }
  0x14   : > { %v296_v33 = vld [vmem:[%s1601_s3 + $0x118] sm:$0xff] (!%p190_p9)  ;;  %v876_v34 = vpack.c.bf16 (!%p190_p9), %v299_v31, %v292_v29  ;;  %v291_v35 = vld [vmem:[%s1601_s3 + $0xf0] sm:$0xff] (!%p190_p9)  ;;  %v298_v36 = vld [vmem:[%s1601_s3 + $0x128] sm:$0xff] (!%p190_p9)  ;;  %545 = vmatprep.mubr.f32.mxu1 (!%p190_p9), %v1074_v14  ;;  %s1007_s8 = scalar_lea.vmem (!%p190_p9), %s1556_s30, 896  ;;  %p1014_p0 = scmp.lt.s32.totalorder (!%p190_p9), %s1556_s30, %s1012_s10 }
  0x15   : > { %s217_s15 = scalar_select %p216_p10, %s1129_s22, 1  ;;  %v304_v37 = vld [vmem:[%s1601_s3 + $0x158] sm:$0xff]  ;;  %843 = vmatpush1.bf16.msra.mxu0 %v842_v22  ;;  %v846_v38 = vpack.c.bf16 %v296_v33, %v289_v32  ;;  %v878_v39 = vpack.c.bf16 %v298_v36, %v291_v35  ;;  %v311_v40 = vld [vmem:[%s1601_s3 + $0x190] sm:$0xff]  ;;  %v306_v41 = vld [vmem:[%s1601_s3 + $0x168] sm:$0xff] }
  0x16   : > { %875 = vmatpush1.bf16.msra.mxu1 %v874_v27  ;;  %v313_v42 = vld [vmem:[%s1601_s3 + $0x1a0] sm:$0xff]  ;;  %845 = vmatprep.subr.bf16.mxu0 %v844_v30  ;;  %v848_v43 = vpack.c.bf16 %v311_v40, %v304_v37  ;;  %v303_v45 = vld [vmem:[%s1601_s3 + $0x150] sm:$0xff]  ;;  %v310_v46 = vld [vmem:[%s1601_s3 + $0x188] sm:$0xff]  ;;  %v1075_v40 = vmov 0.0|0.0   ;;  %s702_s22 = scalar_lea.sflag [#allocation3], %s213_s14  ;;  %p1008_p11 = scmp.ne.s32.totalorder %s1556_s30, %s1007_s8 }
  0x17   : > { %s779_s12 = sshll.u32 %s217_s15, 3  ;;  %877 = vmatprep.subr.bf16.mxu1 %v876_v34  ;;  %v880_v44 = vpack.c.bf16 %v313_v42, %v306_v41  ;;  %v305_v47 = vld [vmem:[%s1601_s3 + $0x160] sm:$0xff]  ;;  %v312_v49 = vld [vmem:[%s1601_s3 + $0x198] sm:$0xff]  ;;  %v318_v50 = vld [vmem:[%s1601_s3 + $0x1c8] sm:$0xff]  ;;  %v850_v54 = vpack.c.bf16 %v310_v46, %v303_v45  ;;  %v228_v41 = vlaneseq  ;;  %p1015_p1 = scmp.lt.s32.totalorder %s1013_s11, %s1007_s8 }
  0x18   : > { %s219_s6 = scalar_lea.vmem %s1598_s0, %s779_s12  ;;  %v325_v51 = vld [vmem:[%s1601_s3 + $0x200] sm:$0xff]  ;;  %v320_v52 = vld [vmem:[%s1601_s3 + $0x1d8] sm:$0xff]  ;;  %v327_v53 = vld [vmem:[%s1601_s3 + $0x210] sm:$0xff]  ;;  %v882_v55 = vpack.c.bf16 %v312_v49, %v305_v47  ;;  %p1009_p12 = pnand %p1008_p11, %p1146_p5 }
  0x19   : > { %v220_v26 = vld [vmem:[%s219_s6] sm:$0xff]  ;;  %847 = vmatpush1.bf16.msra.mxu0 %v846_v38  ;;  %v324_v57 = vld [vmem:[%s1601_s3 + $0x1f8] sm:$0xff]  ;;  %v852_v58 = vpack.c.bf16 %v325_v51, %v318_v50  ;;  %v884_v59 = vpack.c.bf16 %v327_v53, %v320_v52  ;;  %v319_v60 = vld [vmem:[%s1601_s3 + $0x1d0] sm:$0xff]  ;;  %v1364_v42 = vshrl.u32 %v228_v41, 7  ;;  %p1016_p2 = por %p1015_p1, %p1014_p0 }
  0x1a   : > { %225 = vperm.xlu0 %1003, %v220_v26   ;;  %251 = vperm.xlu1 %1005, %v220_v26   ;;  %v317_v56 = vld [vmem:[%s1601_s3 + $0x1c0] sm:$0xff]  ;;  %v326_v61 = vld [vmem:[%s1601_s3 + $0x208] sm:$0xff]  ;;  %v332_v62 = vld [vmem:[%s1601_s3 + $0x238] sm:$0xff]  ;;  %p1010_p13 = pneg %p1009_p12 }
  0x1b   : > { %879 = vmatpush1.bf16.msra.mxu1 %v878_v39  ;;  %849 = vmatprep.subr.bf16.mxu0 %v848_v43  ;;  %v339_v63 = vld [vmem:[%s1601_s3 + $0x270] sm:$0xff]  ;;  %v334_v0 = vld [vmem:[%s1601_s3 + $0x248] sm:$0xff]  ;;  %v341_v1 = vld [vmem:[%s1601_s3 + $0x280] sm:$0xff]  ;;  %v854_v2 = vpack.c.bf16 %v324_v57, %v317_v56  ;;  %v886_v4 = vpack.c.bf16 %v326_v61, %v319_v60  ;;  %v230_v43 = vsub.s32 0, %v1364_v42  ;;  %v246_v46 = vsub.s32 1, %v1364_v42 }
  0x1c   : > { %881 = vmatprep.subr.bf16.mxu1 %v880_v44  ;;  %v331_v5 = vld [vmem:[%s1601_s3 + $0x230] sm:$0xff]  ;;  %v338_v6 = vld [vmem:[%s1601_s3 + $0x268] sm:$0xff]  ;;  %v856_v7 = vpack.c.bf16 %v339_v63, %v332_v62  ;;  %v888_v8 = vpack.c.bf16 %v341_v1, %v334_v0  ;;  %v340_v9 = vld [vmem:[%s1601_s3 + $0x278] sm:$0xff]  ;;  %v256_v47 = vsub.s32 2, %v1364_v42  ;;  %p1017_p3 = pnand %p1016_p2, %p1010_p13 }
  0x1d   : > { %851 = vmatpush1.bf16.msra.mxu0 %v850_v54  ;;  %v346_v10 = vld [vmem:[%s1601_s3 + $0x2a8] sm:$0xff]  ;;  %v353_v11 = vld [vmem:[%s1601_s3 + $0x2e0] sm:$0xff]  ;;  %v348_v12 = vld [vmem:[%s1601_s3 + $0x2b8] sm:$0xff]  ;;  %v858_v15 = vpack.c.bf16 %v338_v6, %v331_v5 }
  0x1e   : > { %1004 = vset.pattern.permute.xlu0 %v1073_v48  ;;  %853 = vmatprep.subr.bf16.mxu0 %v852_v58  ;;  %v355_v13 = vld [vmem:[%s1601_s3 + $0x2f0] sm:$0xff]  ;;  %v345_v17 = vld [vmem:[%s1601_s3 + $0x2a0] sm:$0xff]  ;;  %v352_v18 = vld [vmem:[%s1601_s3 + $0x2d8] sm:$0xff]  ;;  %v860_v19 = vpack.c.bf16 %v353_v11, %v346_v10 }
  0x1f   : > { %241 = vperm.xlu0 %1004, %v220_v26   ;;  %883 = vmatpush1.bf16.msra.mxu1 %v882_v55  ;;  %v892_v20 = vpack.c.bf16 %v355_v13, %v348_v12  ;;  %v347_v21 = vld [vmem:[%s1601_s3 + $0x2b0] sm:$0xff]  ;;  %v354_v22 = vld [vmem:[%s1601_s3 + $0x2e8] sm:$0xff]  ;;  %v360_v23 = vld [vmem:[%s1601_s3 + $0x318] sm:$0xff]  ;;  %v862_v27 = vpack.c.bf16 %v352_v18, %v345_v17 }
  0x20   : > { %885 = vmatprep.subr.bf16.mxu1 %v884_v59  ;;  %v367_v24 = vld [vmem:[%s1601_s3 + $0x350] sm:$0xff]  ;;  %v362_v25 = vld [vmem:[%s1601_s3 + $0x328] sm:$0xff]  ;;  %v369_v26 = vld [vmem:[%s1601_s3 + $0x360] sm:$0xff]  ;;  %v894_v28 = vpack.c.bf16 %v354_v22, %v347_v21 }
  0x21   : > { %855 = vmatpush1.bf16.msra.mxu0 %v854_v2  ;;  %v359_v29 = vld [vmem:[%s1601_s3 + $0x310] sm:$0xff]  ;;  %v864_v30 = vpack.c.bf16 %v367_v24, %v360_v23  ;;  %v896_v31 = vpack.c.bf16 %v369_v26, %v362_v25  ;;  %v366_v32 = vld [vmem:[%s1601_s3 + $0x348] sm:$0xff]  ;;  %v361_v33 = vld [vmem:[%s1601_s3 + $0x320] sm:$0xff] }
  0x22   : > { %857 = vmatprep.subr.bf16.mxu0 %v856_v7  ;;  %v368_v34 = vld [vmem:[%s1601_s3 + $0x358] sm:$0xff]  ;;  %v266_v35 = vld [vmem:[%s1601_s3 + $0x28] sm:$0xff]  ;;  %v273_v36 = vld [vmem:[%s1601_s3 + $0x60] sm:$0xff]  ;;  %v866_v37 = vpack.c.bf16 %v366_v32, %v359_v29 }
  0x23   : > { %1006 = vset.pattern.permute.xlu0 %v1072_v3  ;;  %v333_v3 = vld [vmem:[%s1601_s3 + $0x240] sm:$0xff]  ;;  %887 = vmatpush1.bf16.msra.mxu1 %v886_v4  ;;  %v898_v38 = vpack.c.bf16 %v368_v34, %v361_v33  ;;  %v900_v39 = vpack.c.bf16 %v273_v36, %v266_v35  ;;  %v272_v60 = vld [vmem:[%s1601_s3 + $0x58] sm:$0xff]  ;;  %v267_v61 = vld [vmem:[%s1601_s3 + $0x30] sm:$0xff] }
  0x24   : > { %v890_v16 = vpack.c.bf16 %v340_v9, %v333_v3  ;;  %889 = vmatprep.subr.bf16.mxu1 %v888_v8  ;;  %v221_v44 = vld [vmem:[%s1599_s1] sm:$0x7]  ;;  %v274_v62 = vld [vmem:[%s1601_s3 + $0x68] sm:$0xff]  ;;  %v280_v63 = vld [vmem:[%s1601_s3 + $0x98] sm:$0xff] }
  0x25   : > { %859 = vmatpush1.bf16.msra.mxu0 %v858_v15  ;;  %v231_v45 = vrot.slane %v221_v44, %v230_v43  ;;  %v247_v50 = vrot.slane %v221_v44, %v246_v46  ;;  %v257_v51 = vrot.slane %v221_v44, %v256_v47  ;;  %v780_v52 = vld [vmem:[%s1600_s2] ss:$0 sm:$0xff]  ;;  %v287_v0 = vld [vmem:[%s1601_s3 + $0xd0] sm:$0xff]  ;;  %v933_v4 = vpack.c.bf16 %v274_v62, %v267_v61  ;;  %v286_v8 = vld [vmem:[%s1601_s3 + $0xc8] sm:$0xff] }
  0x26   : > { %861 = vmatprep.subr.bf16.mxu0 %v860_v19  ;;  %v265_v58 = vld [vmem:[%s1601_s3 + $0x20] sm:$0xff]  ;;  %v279_v5 = vld [vmem:[%s1601_s3 + $0x90] sm:$0xff]  ;;  %v904_v7 = vpack.c.bf16 %v287_v0, %v280_v63  ;;  %v288_v9 = vld [vmem:[%s1601_s3 + $0xd8] sm:$0xff] }
  0x27   : > { %891 = vmatpush1.bf16.msra.mxu1 %v890_v16  ;;  %v902_v2 = vpack.c.bf16 %v272_v60, %v265_v58  ;;  %v281_v3 = vld [vmem:[%s1601_s3 + $0xa0] sm:$0xff]  ;;  %v294_v10 = vld [vmem:[%s1601_s3 + $0x108] sm:$0xff]  ;;  %v906_v12 = vpack.c.bf16 %v286_v8, %v279_v5  ;;  %v300_v17 = vld [vmem:[%s1601_s3 + $0x138] sm:$0xff] }
  0x28   : > { %893 = vmatprep.subr.bf16.mxu1 %v892_v20  ;;  %v301_v11 = vld [vmem:[%s1601_s3 + $0x140] sm:$0xff]  ;;  %v936_v13 = vpack.c.bf16 %v288_v9, %v281_v3  ;;  %v295_v18 = vld [vmem:[%s1601_s3 + $0x110] sm:$0xff]  ;;  %v302_v19 = vld [vmem:[%s1601_s3 + $0x148] sm:$0xff]  ;;  %v389_v9 = vsub.s32 3, %v1364_v42 }
  0x29   : > { %863 = vmatpush1.bf16.msra.mxu0 %v862_v27  ;;  %v293_v15 = vld [vmem:[%s1601_s3 + $0x100] sm:$0xff]  ;;  %v908_v16 = vpack.c.bf16 %v301_v11, %v294_v10  ;;  %v308_v20 = vld [vmem:[%s1601_s3 + $0x178] sm:$0xff]  ;;  %v315_v21 = vld [vmem:[%s1601_s3 + $0x1b0] sm:$0xff]  ;;  %v939_v23 = vpack.c.bf16 %v302_v19, %v295_v18 }
  0x2a   : > { %865 = vmatprep.subr.bf16.mxu0 %v864_v30  ;;  %v910_v22 = vpack.c.bf16 %v300_v17, %v293_v15  ;;  %v307_v24 = vld [vmem:[%s1601_s3 + $0x170] sm:$0xff]  ;;  %v912_v25 = vpack.c.bf16 %v315_v21, %v308_v20  ;;  %v314_v26 = vld [vmem:[%s1601_s3 + $0x1a8] sm:$0xff]  ;;  %v316_v27 = vld [vmem:[%s1601_s3 + $0x1b8] sm:$0xff] }
  0x2b   : > { %895 = vmatpush1.bf16.msra.mxu1 %v894_v28  ;;  %v322_v28 = vld [vmem:[%s1601_s3 + $0x1e8] sm:$0xff]  ;;  %v329_v29 = vld [vmem:[%s1601_s3 + $0x220] sm:$0xff]  ;;  %v914_v30 = vpack.c.bf16 %v314_v26, %v307_v24  ;;  %v328_v34 = vld [vmem:[%s1601_s3 + $0x218] sm:$0xff] }
  0x2c   : > { %897 = vmatprep.subr.bf16.mxu1 %v896_v31  ;;  %v321_v32 = vld [vmem:[%s1601_s3 + $0x1e0] sm:$0xff]  ;;  %v916_v33 = vpack.c.bf16 %v329_v29, %v322_v28  ;;  %v323_v35 = vld [vmem:[%s1601_s3 + $0x1f0] sm:$0xff]  ;;  %v330_v36 = vld [vmem:[%s1601_s3 + $0x228] sm:$0xff] }
  0x2d   : > { %867 = vmatpush1.bf16.msra.mxu0 %v866_v37  ;;  %v336_v37 = vld [vmem:[%s1601_s3 + $0x258] sm:$0xff]  ;;  %v945_v41 = vpack.c.bf16 %v330_v36, %v323_v35  ;;  %v335_v44 = vld [vmem:[%s1601_s3 + $0x250] sm:$0xff]  ;;  %v373_v3 = vld [vmem:[%s1602_s4] sm:$0x7f] }
  0x2e   : > { %901 = vmatprep.subr.bf16.mxu0 %v900_v39  ;;  %v918_v39 = vpack.c.bf16 %v328_v34, %v321_v32  ;;  %v351_v58 = vld [vmem:[%s1601_s3 + $0x2d0] sm:$0xff]  ;;  %v364_v60 = vld [vmem:[%s1601_s3 + $0x338] sm:$0xff]  ;;  %v378_v10 = vrot.slane %v373_v3, %v230_v43  ;;  %v382_v11 = vrot.slane %v373_v3, %v246_v46  ;;  %v393_v43 = vsub.s32 4, %v1364_v42 }
  0x2f   : > { %899 = vmatpush1.bf16.msra.mxu1 %v898_v38  ;;  %v343_v38 = vld [vmem:[%s1601_s3 + $0x290] sm:$0xff]  ;;  %v372_v5 = vld [vmem:[%s1601_s3 + $0x378] sm:$0xff]  ;;  %v397_v46 = vsub.s32 5, %v1364_v42 }
  0x30   : > { %932 = vmatprep.subr.bf16.mxu1 %v1075_v40  ;;  %v371_v61 = vld [vmem:[%s1601_s3 + $0x370] sm:$0xff]  ;;  %v394_v21 = vrot.slane %v373_v3, %v393_v43 }
  0x31   : > { %v363_v0 = vld [vmem:[%s1601_s3 + $0x330] sm:$0xff] }
  0x99   : > { %v226_v48 = vpop.permute.xlu0 %225  ;;  %v252_v53 = vpop.permute.xlu1 %251 }
  0x9a   : > { %v232_v49 = vmul.f32 %v231_v45, %v226_v48  ;;  %v258_v57 = vmul.f32 %v257_v51, %v252_v53  ;;  %v920_v45 = vpack.c.bf16 %v343_v38, %v336_v37  ;;  %v342_v48 = vld [vmem:[%s1601_s3 + $0x288] sm:$0xff] }
  0x9b   : > { %v350_v51 = vld [vmem:[%s1601_s3 + $0x2c8] sm:$0xff]  ;;  %v922_v53 = vpack.c.bf16 %v342_v48, %v335_v44 }
  0x9c   : > { %v239_v55 = vadd.f32 %v780_v52, %v232_v49  ;;  %v337_v49 = vld [vmem:[%s1601_s3 + $0x260] sm:$0xff] }
  0x9d   : > { %v357_v52 = vld [vmem:[%s1601_s3 + $0x300] sm:$0xff] }
  0x9e   : > { %v242_v54 = vpop.permute.xlu0 %241 }
  0x9f   : > { %v248_v56 = vmul.f32 %v247_v50, %v242_v54  ;;  %v344_v50 = vld [vmem:[%s1601_s3 + $0x298] sm:$0xff] }
  0xa0   : > { %v948_v54 = vpack.c.bf16 %v344_v50, %v337_v49 }
  0xa1   : > { %v249_v59 = vadd.f32 %v248_v56, %v239_v55  ;;  %v349_v55 = vld [vmem:[%s1601_s3 + $0x2c0] sm:$0xff]  ;;  %v924_v56 = vpack.c.bf16 %v357_v52, %v350_v51 }
  0xa3   : > { %v259_v1 = vadd.f32 %v258_v57, %v249_v59  ;;  %v356_v57 = vld [vmem:[%s1601_s3 + $0x2f8] sm:$0xff]  ;;  %v358_v59 = vld [vmem:[%s1601_s3 + $0x308] sm:$0xff] }
  0xa4   : > { %v926_v62 = vpack.c.bf16 %v356_v57, %v349_v55  ;;  %v951_v63 = vpack.c.bf16 %v358_v59, %v351_v58 }
  0xa5   : > { %v1402_v6 = vmax.f32 %v259_v1, 0.0  ;;  %v928_v1 = vpack.c.bf16 %v371_v61, %v364_v60 }
  0xa7   : > { %475 = vmatmul.mubr.f32.vlgmr.msra.gmra.mrb[0].mxu0 %v1402_v6  ;;  %546 = vmatmul.mubr.f32.vlgmr.msra.gmra.mrb[0].mxu1 %v1402_v6 }
  0xa8   : > { %903 = vmatpush1.bf16.msra.mxu0 %v902_v2  ;;  %934 = vmatpush3.bf16.msra.mxu1 %v933_v4  ;;  %v370_v2 = vld [vmem:[%s1601_s3 + $0x368] sm:$0xff]  ;;  %v365_v4 = vld [vmem:[%s1601_s3 + $0x340] sm:$0xff] }
  0xa9   : > { %905 = vmatprep.subr.bf16.mxu0 %v904_v7  ;;  %935 = vmatprep.subr.bf16.mxu1 %v1075_v40  ;;  %v930_v7 = vpack.c.bf16 %v370_v2, %v363_v0  ;;  %v954_v8 = vpack.c.bf16 %v372_v5, %v365_v4 }
  0xaa   : > { %616 = vmatprep.mubr.f32.mxu0 %v1074_v14  ;;  %833 = vmatprep.mubr.msk.f32.mxu1 %vm1076_vm0, %v1074_v14  ;;  %v309_v14 = vld [vmem:[%s1601_s3 + $0x180] sm:$0xff] }
  0xab   : > { %v942_v31 = vpack.c.bf16 %v316_v27, %v309_v14 }
  0xac   : > { %907 = vmatpush1.bf16.msra.mxu0 %v906_v12  ;;  %937 = vmatpush3.bf16.msra.mxu1 %v936_v13  ;;  %v390_v12 = vrot.slane %v373_v3, %v389_v9 }
  0xad   : > { %909 = vmatprep.subr.bf16.mxu0 %v908_v16  ;;  %938 = vmatprep.subr.bf16.mxu1 %v1075_v40 }
  0xb0   : > { %911 = vmatpush1.bf16.msra.mxu0 %v910_v22  ;;  %940 = vmatpush3.bf16.msra.mxu1 %v939_v23  ;;  %v398_v23 = vrot.slane %v373_v3, %v397_v46 }
  0xb1   : > { %913 = vmatprep.subr.bf16.mxu0 %v912_v25  ;;  %941 = vmatprep.subr.bf16.mxu1 %v1075_v40 }
  0xb4   : > { %915 = vmatpush1.bf16.msra.mxu0 %v914_v30  ;;  %943 = vmatpush3.bf16.msra.mxu1 %v942_v31 }
  0xb5   : > { %917 = vmatprep.subr.bf16.mxu0 %v916_v33  ;;  %944 = vmatprep.subr.bf16.mxu1 %v1075_v40 }
  0xb8   : > { %919 = vmatpush1.bf16.msra.mxu0 %v918_v39  ;;  %946 = vmatpush3.bf16.msra.mxu1 %v945_v41 }
  0xb9   : > { %921 = vmatprep.subr.bf16.mxu0 %v920_v45  ;;  %947 = vmatprep.subr.bf16.mxu1 %v1075_v40 }
  0xbc   : > { %923 = vmatpush1.bf16.msra.mxu0 %v922_v53  ;;  %949 = vmatpush3.bf16.msra.mxu1 %v948_v54 }
  0xbd   : > { %925 = vmatprep.subr.bf16.mxu0 %v924_v56  ;;  %950 = vmatprep.subr.bf16.mxu1 %v1075_v40 }
  0xc0   : > { %927 = vmatpush1.bf16.msra.mxu0 %v926_v62  ;;  %952 = vmatpush3.bf16.msra.mxu1 %v951_v63 }
  0xc1   : > { %929 = vmatprep.subr.bf16.mxu0 %v928_v1  ;;  %953 = vmatprep.subr.bf16.mxu1 %v1075_v40  ;;  %v386_v40 = vrot.slane %v373_v3, %v256_v47  ;;  %v401_v47 = vsub.s32 6, %v1364_v42 }
  0xc3   : > { %v402_v22 = vrot.slane %v373_v3, %v401_v47 }
  0xc4   : > { %931 = vmatpush1.bf16.msra.mxu0 %v930_v7  ;;  %955 = vmatpush3.bf16.msra.mxu1 %v954_v8 }
  0xc7   : > { %617 = vmatmul.mubr.f32.vlgmr.msra.gmra.mrb[2].mxu0 %v1402_v6  ;;  %834 = vmatmul.mubr.f32.vlgmr.msra.gmra.mrb[2].mxu1 %v1402_v6 }
 0x17a   : > { %v476_v6 = vpop.f32.mrb[0].mxu0  ;;  %v547_v13 = vpop.f32.mrb[0].mxu1 }
 0x17b   : > { %v477_v15 = vadd.f32 %v476_v6, %v378_v10  ;;  %v548_v16 = vadd.f32 %v547_v13, %v386_v40  ;;  %v478_v17 = vpop.f32.mrb[1].mxu0  ;;  %v549_v18 = vpop.f32.mrb[1].mxu1 }
 0x17c   : > { %v479_v19 = vadd.f32 %v478_v17, %v382_v11  ;;  %v550_v20 = vadd.f32 %v549_v18, %v390_v12 }
 0x17d   : > { %693 = vst [vmem:[%s215_s25] sm:$0xff] %v477_v15  ;;  %695 = vst [vmem:[%s215_s25 + $0x10] sm:$0xff] %v548_v16 }
 0x17e   : > { %694 = vst [vmem:[%s215_s25 + $0x8] sm:$0xff] %v479_v19  ;;  %696 = vst [vmem:[%s215_s25 + $0x18] sm:$0xff] %v550_v20 }
 0x19a   : > { %v618_v24 = vpop.f32.mrb[2].mxu0  ;;  %v689_v25 = vpop.f32.mrb[2].mxu1 }
 0x19b   : > { %v619_v26 = vadd.f32 %v618_v24, %v394_v21  ;;  %v690_v14 = vadd.f32 %v689_v25, %v402_v22  ;;  %v620_v27 = vpop.f32.mrb[3].mxu0  ;;  %v835_v28 = vpop.f32.mrb[3].mxu1 }
 0x19c   : > { %v621_v29 = vadd.f32 %v620_v27, %v398_v23 }
 0x19d   : > { %697 = vst [vmem:[%s215_s25 + $0x20] sm:$0xff] %v619_v26  ;;  %700 = vst.msk [vmem:[%s215_s25 + $0x30] sm:$0xff] %vm699_vm1, %v690_v14 }
 0x19e   : > { %698 = vst [vmem:[%s215_s25 + $0x28] sm:$0xff] %v621_v29 }
 0x19f   : > { %1020 = shalt.err (!%p1017_p3)
}
 0x1a0   : > { %s1021_s12 = scalar_lea.hbm %s1554_s7, 896  ;;  %s1025_s16 = scalar_lea.hbm %s1603_s5, 1792 }
 0x1a1   : > { %p1022_p4 = scmp.ne.s32.totalorder %s1554_s7, %s1021_s12  ;;  %p1026_p9 = scmp.lt.u32.totalorder %s1554_s7, %s1603_s5 }
 0x1a2   : > { %p1027_p10 = scmp.lt.u32.totalorder %s1025_s16, %s1021_s12  ;;  %p1029_p12 = scmp.lt.u32.totalorder %s1021_s12, %s1554_s7 }
 0x1a3   : > { %p1023_p7 = pnand %p1022_p4, %p1146_p5 }
 0x1a4   : > { %p1028_p11 = por %p1027_p10, %p1026_p9 }
 0x1a5   : > { %p1024_p8 = pneg %p1023_p7 }
 0x1a6   : > { %p1030_p13 = por %p1029_p12, %p1028_p11 }
 0x1a8   : > { %p1031_p0 = pnand %p1030_p13, %p1024_p8 }
 0x1aa   : > { %1034 = shalt.err (!%p1031_p0)
}
 0x1ab   : > { %958 = dma.vmem_to_hbm [thread:$0]  (%p1146_p5), %s1556_s30, 896, %s1554_s7, %s702_s22  }
 0x1ac PF: > { %p964_p1 = scmp.ge.s32.totalorder %s1069_s21, 2  ;;  %s728_s25 = sand.u32 1, %s1057_s18  }
 0x1ad   : > { %s729_s26 = scalar_lea.sflag [#allocation3], %s728_s25 }
 0x1ae   : > { %p961_p2 = pnand %p964_p1, %p1150_p6 }
 0x1b0   : > { %1052 = dma.done.wait (!%p961_p2), %s729_s26, 896  }
 0x1b1   : > { %1054 = vsyncadd (!%p961_p2), %s729_s26, 4294966400  ;;  %p15_p3 = scmp.ge.s32.totalorder %s1133_s24, 4   ;;  %s1606_s18 = smov %s1061_s19 }
 0x1b2   : > { %s1607_s19 = smov %s1065_s20  ;;  %s1608_s20 = smov %s1144_s27 }
 0x1b3   : > { %s1609_s21 = smov %s1133_s24  ;;  %17 = sbr.rel (!%p15_p3) target bundleno = 3 (0x3), region = 75 }
 0x1ba   :  { %734 = vsyncpa [#allocation3], 1 }
 0x1bb   :  { %736 = vsyncpa [#allocation3 + $0x1], 1 }

</bundles_post_ra>
